<compile_context>
chip_gen: v5e
topology: v5e:2x2
jax: 0.10.0
libtpu: 0.0.40
codegen_flags: <defaults>
</compile_context>

<pallas_src>
import functools

import jax
import jax.numpy as jnp
from jax import lax
from jax.experimental import pallas as pl
from jax.experimental.pallas import tpu as pltpu


def _round_up(x: int, m: int) -> int:
    return ((x + m - 1) // m) * m


def _gather_kernel(tok_ref, weight_hbm, out_ref, sem, *, tok_tile: int, vocab: int):
    """Gather `tok_tile` embedding rows from HBM straight into the output tile."""
    base = pl.program_id(0) * tok_tile

    # Issue all row DMAs for this tile; every copy signals the same DMA sem.
    def _issue(t, carry):
        row = jnp.clip(tok_ref[base + t], 0, vocab - 1)    # guard OOB token ids
        pltpu.make_async_copy(
            weight_hbm.at[row],      # (E_pad,) row in HBM
            out_ref.at[t],           # (E_pad,) row of the pipelined output block
            sem,
        ).start()
        return carry

    lax.fori_loop(0, tok_tile, _issue, None, unroll=8)

    # One aggregate wait: the DMA semaphore counts bytes, so a descriptor that
    # covers the full (tok_tile, E_pad) tile equals the sum of the tok_tile
    # identically-sized row copies issued above.  (Fragile if per-row sizes
    # ever differ -- keep all rows E_pad wide.)
    pltpu.make_async_copy(out_ref, out_ref, sem).wait()


def pad_embedding_table(weight: jax.Array) -> jax.Array:
    """One-time, init-side pad of the embedding dim up to a multiple of 128 lanes."""
    V, E = weight.shape
    E_pad = _round_up(E, 128)
    if E_pad > E:
        weight = jnp.pad(weight, ((0, 0), (0, E_pad - E)))
    return weight


def embedding_forward(tokens: jax.Array, weight_padded: jax.Array,
                      emb_size: int | None = None, padding_idx: int = 0,
                      tok_tile: int = 256):
    """Jittable forward. Returns (emb [B,S,E], lengths [B] int32, masks [B,S] bool).

    `weight_padded` must already have its last dim padded to a multiple of 128
    (call `pad_embedding_table` once at init); `emb_size` is the true E.
    """
    B, S = tokens.shape
    V, E_pad = weight_padded.shape
    if emb_size is None:
        emb_size = E_pad
    if E_pad % 128 != 0:
        raise ValueError("Pad the embedding table once at init with pad_embedding_table().")

    n_tokens = B * S
    # Keep >=2 grid steps when possible so ("parallel",) can use both v7x TensorCores.
    max_tile = max(8, _round_up((n_tokens + 1) // 2, 8))
    tok_tile = _round_up(max(8, min(tok_tile, max_tile)), 8)
    n_pad = _round_up(n_tokens, tok_tile)

    tokens_flat = tokens.reshape(n_tokens).astype(jnp.int32)
    if n_pad > n_tokens:
        tokens_flat = jnp.pad(tokens_flat, (0, n_pad - n_tokens),
                              constant_values=padding_idx)

    kernel = functools.partial(_gather_kernel, tok_tile=tok_tile, vocab=V)

    out_flat = pl.pallas_call(
        kernel,
        out_shape=jax.ShapeDtypeStruct((n_pad, E_pad), weight_padded.dtype),
        grid_spec=pltpu.PrefetchScalarGridSpec(
            num_scalar_prefetch=1,                          # token ids -> SMEM
            grid=(n_pad // tok_tile,),
            in_specs=[pl.BlockSpec(memory_space=pl.ANY)],   # table stays in HBM
            out_specs=pl.BlockSpec((tok_tile, E_pad), lambda i, tok: (i, 0)),
            scratch_shapes=[pltpu.SemaphoreType.DMA],       # one shared DMA sem
        ),
        compiler_params=pltpu.CompilerParams(
            dimension_semantics=("parallel",)),
    )(tokens_flat, weight_padded)

    # Skip the slice entirely when no padding was needed (E multiple of 128 and
    # B*S multiple of tok_tile) -- avoids an extra read+write of the output.
    if n_pad == n_tokens and E_pad == emb_size:
        emb = out_flat.reshape(B, S, emb_size)
    else:
        emb = out_flat[:n_tokens, :emb_size].reshape(B, S, emb_size)

    # Mask / length: trivial elementwise work, done in plain JAX (XLA).
    masks = tokens != padding_idx
    lengths = jnp.sum(masks, axis=-1).astype(jnp.int32)

    # Dropout(0.2): eval-mode identity.
    return emb, lengths, masks


if __name__ == "__main__":
    # Small, deterministic setup (batch=2, seq=8, vocab=64, emb=32).
    B, S = 2, 8
    V, E = 64, 32
    PAD = 0

    key = jax.random.PRNGKey(0)
    k_w, k_tok = jax.random.split(key)

    # Embedding table ~ N(0,1); row at padding_idx zeroed, matching
    # nn.Embedding(padding_idx=0) init.
    weight = jax.random.normal(k_w, (V, E), dtype=jnp.float32)
    weight = weight.at[PAD].set(0.0)

    # Ragged token ids in [1, V), padded with 0 at the tail.
    tokens = jax.random.randint(k_tok, (B, S), 1, V, dtype=jnp.int32)
    tokens = tokens.at[0, 6:].set(PAD)   # length 6
    tokens = tokens.at[1, 5:].set(PAD)   # length 5

    # One-time init-side lane padding of the table (NOT inside the jitted forward).
    weight_padded = pad_embedding_table(weight)

    fwd = jax.jit(functools.partial(embedding_forward, emb_size=E, padding_idx=PAD))
    emb_full, lengths, masks = fwd(tokens, weight_padded)
    jax.block_until_ready((emb_full, lengths, masks))

    # ---- correctness vs. pure-JAX reference (full length) ----
    ref_emb_full = weight[tokens]                              # (B, S, E)
    ref_mask = tokens != PAD
    ref_len = jnp.sum(ref_mask, axis=-1).astype(jnp.int32)
    assert emb_full.shape == (B, S, E)
    assert jnp.allclose(emb_full, ref_emb_full, atol=1e-5)
    assert jnp.array_equal(lengths, ref_len)
    assert jnp.array_equal(masks, ref_mask)

    # ---- PyTorch-parity truncation (data dependent -> host side, outside jit) ----
    max_len = int(lengths.max())
    emb_out, mask_out = emb_full[:, :max_len], masks[:, :max_len]
    assert emb_out.shape == (B, max_len, E)
    assert jnp.allclose(emb_out, ref_emb_full[:, :max_len], atol=1e-5)
    assert jnp.array_equal(mask_out, ref_mask[:, :max_len])

    print("KERNEL_OK")
</pallas_src>

<mosaic_0001>
module attributes {stable_mosaic.version = 11 : i64} {
  func.func @_gather_kernel(%arg0: i32, %arg1: memref<16xi32, #tpu.memory_space<smem>>, %arg2: memref<64x128xf32, #tpu.memory_space<any>>, %arg3: memref<8x128xf32, #tpu.memory_space<vmem>>, %arg4: memref<!tpu.dma_semaphore, #tpu.memory_space<semaphore_mem>>) attributes {dimension_semantics = [#tpu.dimension_semantics<parallel>], iteration_bounds = array<i64: 2>, scalar_prefetch = 1 : i64, scratch_operands = 1 : i64, tpu.core_type = #tpu.core_type<tc>, window_params = [{}, {transform_indices = @transform_1, window_bounds = array<i64: 8, 128>}]} {
    %c8_i32 = arith.constant 8 : i32
    %0 = arith.muli %arg0, %c8_i32 : i32
    %c0_i32 = arith.constant 0 : i32
    %1 = arith.addi %0, %c0_i32 : i32
    %2 = arith.index_cast %1 : i32 to index
    %3 = memref.load %arg1[%2] : memref<16xi32, #tpu.memory_space<smem>>
    %c0_i32_0 = arith.constant 0 : i32
    %c63_i32 = arith.constant 63 : i32
    %4 = arith.maxsi %c0_i32_0, %3 : i32
    %5 = arith.minsi %c63_i32, %4 : i32
    %c0_i32_1 = arith.constant 0 : i32
    %6 = tpu.memref_slice %arg2[%5, %c0_i32_1] : memref<64x128xf32, #tpu.memory_space<any>> -> memref<1x128xf32, #tpu.memory_space<any>>
    %7 = tpu.memref_squeeze %6 : memref<1x128xf32, #tpu.memory_space<any>> -> memref<128xf32, #tpu.memory_space<any>>
    %c0_i32_2 = arith.constant 0 : i32
    %8 = tpu.memref_slice %arg3[%c0_i32, %c0_i32_2] : memref<8x128xf32, #tpu.memory_space<vmem>> -> memref<1x128xf32, #tpu.memory_space<vmem>>
    %9 = tpu.memref_squeeze %8 : memref<1x128xf32, #tpu.memory_space<vmem>> -> memref<128xf32, #tpu.memory_space<vmem>>
    tpu.enqueue_dma source(%7 : memref<128xf32, #tpu.memory_space<any>>) target(%9 : memref<128xf32, #tpu.memory_space<vmem>>) target_semaphore(%arg4 : memref<!tpu.dma_semaphore, #tpu.memory_space<semaphore_mem>>)
    %c1_i32 = arith.constant 1 : i32
    %10 = arith.addi %0, %c1_i32 : i32
    %11 = arith.index_cast %10 : i32 to index
    %12 = memref.load %arg1[%11] : memref<16xi32, #tpu.memory_space<smem>>
    %c0_i32_3 = arith.constant 0 : i32
    %c63_i32_4 = arith.constant 63 : i32
    %13 = arith.maxsi %c0_i32_3, %12 : i32
    %14 = arith.minsi %c63_i32_4, %13 : i32
    %c0_i32_5 = arith.constant 0 : i32
    %15 = tpu.memref_slice %arg2[%14, %c0_i32_5] : memref<64x128xf32, #tpu.memory_space<any>> -> memref<1x128xf32, #tpu.memory_space<any>>
    %16 = tpu.memref_squeeze %15 : memref<1x128xf32, #tpu.memory_space<any>> -> memref<128xf32, #tpu.memory_space<any>>
    %c0_i32_6 = arith.constant 0 : i32
    %17 = tpu.memref_slice %arg3[%c1_i32, %c0_i32_6] : memref<8x128xf32, #tpu.memory_space<vmem>> -> memref<1x128xf32, #tpu.memory_space<vmem>>
    %18 = tpu.memref_squeeze %17 : memref<1x128xf32, #tpu.memory_space<vmem>> -> memref<128xf32, #tpu.memory_space<vmem>>
    tpu.enqueue_dma source(%16 : memref<128xf32, #tpu.memory_space<any>>) target(%18 : memref<128xf32, #tpu.memory_space<vmem>>) target_semaphore(%arg4 : memref<!tpu.dma_semaphore, #tpu.memory_space<semaphore_mem>>)
    %c2_i32 = arith.constant 2 : i32
    %19 = arith.addi %0, %c2_i32 : i32
    %20 = arith.index_cast %19 : i32 to index
    %21 = memref.load %arg1[%20] : memref<16xi32, #tpu.memory_space<smem>>
    %c0_i32_7 = arith.constant 0 : i32
    %c63_i32_8 = arith.constant 63 : i32
    %22 = arith.maxsi %c0_i32_7, %21 : i32
    %23 = arith.minsi %c63_i32_8, %22 : i32
    %c0_i32_9 = arith.constant 0 : i32
    %24 = tpu.memref_slice %arg2[%23, %c0_i32_9] : memref<64x128xf32, #tpu.memory_space<any>> -> memref<1x128xf32, #tpu.memory_space<any>>
    %25 = tpu.memref_squeeze %24 : memref<1x128xf32, #tpu.memory_space<any>> -> memref<128xf32, #tpu.memory_space<any>>
    %c0_i32_10 = arith.constant 0 : i32
    %26 = tpu.memref_slice %arg3[%c2_i32, %c0_i32_10] : memref<8x128xf32, #tpu.memory_space<vmem>> -> memref<1x128xf32, #tpu.memory_space<vmem>>
    %27 = tpu.memref_squeeze %26 : memref<1x128xf32, #tpu.memory_space<vmem>> -> memref<128xf32, #tpu.memory_space<vmem>>
    tpu.enqueue_dma source(%25 : memref<128xf32, #tpu.memory_space<any>>) target(%27 : memref<128xf32, #tpu.memory_space<vmem>>) target_semaphore(%arg4 : memref<!tpu.dma_semaphore, #tpu.memory_space<semaphore_mem>>)
    %c3_i32 = arith.constant 3 : i32
    %28 = arith.addi %0, %c3_i32 : i32
    %29 = arith.index_cast %28 : i32 to index
    %30 = memref.load %arg1[%29] : memref<16xi32, #tpu.memory_space<smem>>
    %c0_i32_11 = arith.constant 0 : i32
    %c63_i32_12 = arith.constant 63 : i32
    %31 = arith.maxsi %c0_i32_11, %30 : i32
    %32 = arith.minsi %c63_i32_12, %31 : i32
    %c0_i32_13 = arith.constant 0 : i32
    %33 = tpu.memref_slice %arg2[%32, %c0_i32_13] : memref<64x128xf32, #tpu.memory_space<any>> -> memref<1x128xf32, #tpu.memory_space<any>>
    %34 = tpu.memref_squeeze %33 : memref<1x128xf32, #tpu.memory_space<any>> -> memref<128xf32, #tpu.memory_space<any>>
    %c0_i32_14 = arith.constant 0 : i32
    %35 = tpu.memref_slice %arg3[%c3_i32, %c0_i32_14] : memref<8x128xf32, #tpu.memory_space<vmem>> -> memref<1x128xf32, #tpu.memory_space<vmem>>
    %36 = tpu.memref_squeeze %35 : memref<1x128xf32, #tpu.memory_space<vmem>> -> memref<128xf32, #tpu.memory_space<vmem>>
    tpu.enqueue_dma source(%34 : memref<128xf32, #tpu.memory_space<any>>) target(%36 : memref<128xf32, #tpu.memory_space<vmem>>) target_semaphore(%arg4 : memref<!tpu.dma_semaphore, #tpu.memory_space<semaphore_mem>>)
    %c4_i32 = arith.constant 4 : i32
    %37 = arith.addi %0, %c4_i32 : i32
    %38 = arith.index_cast %37 : i32 to index
    %39 = memref.load %arg1[%38] : memref<16xi32, #tpu.memory_space<smem>>
    %c0_i32_15 = arith.constant 0 : i32
    %c63_i32_16 = arith.constant 63 : i32
    %40 = arith.maxsi %c0_i32_15, %39 : i32
    %41 = arith.minsi %c63_i32_16, %40 : i32
    %c0_i32_17 = arith.constant 0 : i32
    %42 = tpu.memref_slice %arg2[%41, %c0_i32_17] : memref<64x128xf32, #tpu.memory_space<any>> -> memref<1x128xf32, #tpu.memory_space<any>>
    %43 = tpu.memref_squeeze %42 : memref<1x128xf32, #tpu.memory_space<any>> -> memref<128xf32, #tpu.memory_space<any>>
    %c0_i32_18 = arith.constant 0 : i32
    %44 = tpu.memref_slice %arg3[%c4_i32, %c0_i32_18] : memref<8x128xf32, #tpu.memory_space<vmem>> -> memref<1x128xf32, #tpu.memory_space<vmem>>
    %45 = tpu.memref_squeeze %44 : memref<1x128xf32, #tpu.memory_space<vmem>> -> memref<128xf32, #tpu.memory_space<vmem>>
    tpu.enqueue_dma source(%43 : memref<128xf32, #tpu.memory_space<any>>) target(%45 : memref<128xf32, #tpu.memory_space<vmem>>) target_semaphore(%arg4 : memref<!tpu.dma_semaphore, #tpu.memory_space<semaphore_mem>>)
    %c5_i32 = arith.constant 5 : i32
    %46 = arith.addi %0, %c5_i32 : i32
    %47 = arith.index_cast %46 : i32 to index
    %48 = memref.load %arg1[%47] : memref<16xi32, #tpu.memory_space<smem>>
    %c0_i32_19 = arith.constant 0 : i32
    %c63_i32_20 = arith.constant 63 : i32
    %49 = arith.maxsi %c0_i32_19, %48 : i32
    %50 = arith.minsi %c63_i32_20, %49 : i32
    %c0_i32_21 = arith.constant 0 : i32
    %51 = tpu.memref_slice %arg2[%50, %c0_i32_21] : memref<64x128xf32, #tpu.memory_space<any>> -> memref<1x128xf32, #tpu.memory_space<any>>
    %52 = tpu.memref_squeeze %51 : memref<1x128xf32, #tpu.memory_space<any>> -> memref<128xf32, #tpu.memory_space<any>>
    %c0_i32_22 = arith.constant 0 : i32
    %53 = tpu.memref_slice %arg3[%c5_i32, %c0_i32_22] : memref<8x128xf32, #tpu.memory_space<vmem>> -> memref<1x128xf32, #tpu.memory_space<vmem>>
    %54 = tpu.memref_squeeze %53 : memref<1x128xf32, #tpu.memory_space<vmem>> -> memref<128xf32, #tpu.memory_space<vmem>>
    tpu.enqueue_dma source(%52 : memref<128xf32, #tpu.memory_space<any>>) target(%54 : memref<128xf32, #tpu.memory_space<vmem>>) target_semaphore(%arg4 : memref<!tpu.dma_semaphore, #tpu.memory_space<semaphore_mem>>)
    %c6_i32 = arith.constant 6 : i32
    %55 = arith.addi %0, %c6_i32 : i32
    %56 = arith.index_cast %55 : i32 to index
    %57 = memref.load %arg1[%56] : memref<16xi32, #tpu.memory_space<smem>>
    %c0_i32_23 = arith.constant 0 : i32
    %c63_i32_24 = arith.constant 63 : i32
    %58 = arith.maxsi %c0_i32_23, %57 : i32
    %59 = arith.minsi %c63_i32_24, %58 : i32
    %c0_i32_25 = arith.constant 0 : i32
    %60 = tpu.memref_slice %arg2[%59, %c0_i32_25] : memref<64x128xf32, #tpu.memory_space<any>> -> memref<1x128xf32, #tpu.memory_space<any>>
    %61 = tpu.memref_squeeze %60 : memref<1x128xf32, #tpu.memory_space<any>> -> memref<128xf32, #tpu.memory_space<any>>
    %c0_i32_26 = arith.constant 0 : i32
    %62 = tpu.memref_slice %arg3[%c6_i32, %c0_i32_26] : memref<8x128xf32, #tpu.memory_space<vmem>> -> memref<1x128xf32, #tpu.memory_space<vmem>>
    %63 = tpu.memref_squeeze %62 : memref<1x128xf32, #tpu.memory_space<vmem>> -> memref<128xf32, #tpu.memory_space<vmem>>
    tpu.enqueue_dma source(%61 : memref<128xf32, #tpu.memory_space<any>>) target(%63 : memref<128xf32, #tpu.memory_space<vmem>>) target_semaphore(%arg4 : memref<!tpu.dma_semaphore, #tpu.memory_space<semaphore_mem>>)
    %c7_i32 = arith.constant 7 : i32
    %64 = arith.addi %0, %c7_i32 : i32
    %65 = arith.index_cast %64 : i32 to index
    %66 = memref.load %arg1[%65] : memref<16xi32, #tpu.memory_space<smem>>
    %c0_i32_27 = arith.constant 0 : i32
    %c63_i32_28 = arith.constant 63 : i32
    %67 = arith.maxsi %c0_i32_27, %66 : i32
    %68 = arith.minsi %c63_i32_28, %67 : i32
    %c0_i32_29 = arith.constant 0 : i32
    %69 = tpu.memref_slice %arg2[%68, %c0_i32_29] : memref<64x128xf32, #tpu.memory_space<any>> -> memref<1x128xf32, #tpu.memory_space<any>>
    %70 = tpu.memref_squeeze %69 : memref<1x128xf32, #tpu.memory_space<any>> -> memref<128xf32, #tpu.memory_space<any>>
    %c0_i32_30 = arith.constant 0 : i32
    %71 = tpu.memref_slice %arg3[%c7_i32, %c0_i32_30] : memref<8x128xf32, #tpu.memory_space<vmem>> -> memref<1x128xf32, #tpu.memory_space<vmem>>
    %72 = tpu.memref_squeeze %71 : memref<1x128xf32, #tpu.memory_space<vmem>> -> memref<128xf32, #tpu.memory_space<vmem>>
    tpu.enqueue_dma source(%70 : memref<128xf32, #tpu.memory_space<any>>) target(%72 : memref<128xf32, #tpu.memory_space<vmem>>) target_semaphore(%arg4 : memref<!tpu.dma_semaphore, #tpu.memory_space<semaphore_mem>>)
    %c8_i32_31 = arith.constant 8 : i32
    tpu.wait_dma2 semaphore(%arg4 : memref<!tpu.dma_semaphore, #tpu.memory_space<semaphore_mem>>) src(%arg3 : memref<8x128xf32, #tpu.memory_space<vmem>>) dst(%arg3 : memref<8x128xf32, #tpu.memory_space<vmem>>)
    return
  }
  func.func @transform_1(%arg0: i32, %arg1: memref<16xi32, #tpu.memory_space<smem>>) -> (i32, i32) {
    %c0_i32 = arith.constant 0 : i32
    %c0_i32_0 = arith.constant 0 : i32
    return %arg0, %c0_i32 : i32, i32
  }
}

</mosaic_0001>

<bundles_post_ra>
// kernel: embedding_forward.1
= control target key start
LH: loop header
LB: loop body
LE: loop exit
PB: predicated region body
PF: predicated region fallthrough
CT: control target
= control target key end

     0   :  { %s627_s12 = smov [#allocation4]   ;;  %s953_s0 = inlined_call_operand.vmem [shape: s32[16], index: 0, kind: input, shape index: {}]   ;;  %s954_s1 = inlined_call_operand.hbm [shape: f32[64,128], index: 1, kind: input, shape index: {}]   ;;  %s955_s2 = inlined_call_operand.vmem [shape: f32[16,128], index: 2, kind: output, shape index: {}]  }
   0x1   :  { %s8_s11 = sshll.u32 %s953_s0, 4  ;;  %s9_s11 = int_to_ptr.vmem [resolvable:$true] %s8_s11 }
   0x2   :  { %11 = dma.vmem_to_smem %s9_s11, 16, %s627_s12, [#allocation3] }
   0x3   :  { %617 = dma.done.wait [#allocation3], 16 }
   0x4   :  { %618 = vsyncadd [#allocation3], 4294967280 }
   0x5   :  { %14 = sfence }
   0x6   :  { %s646_s13 = smov 0  }
   0x7 LB: > { %p367_p0 = scmp.lt.s32.totalorder %s625_s13, 2  ;;  %p52_p1 = scmp.lt.s32.totalorder %s625_s13, 1  ;;  %s625_s13 = sphi %s646_s13, %s20_s13  }
   0x8   : > { %s654_s0 = sshll.u32 %s625_s13, 3  ;;  %s702_s10 = scalar_lea.hbm %s954_s1, 64 }
   0x9   : > { %s342_s14 = scalar_select %p367_p0, [#allocation4], [#allocation23] }
   0xa   : > { %s53_s15 = scalar_select %p52_p1, %s625_s13, 1 }
   0xb   : > { %s343_s16 = scalar_select %p367_p0, %s654_s0, 0 }
   0xc   : > { %s280_s17 = sshll.u32 %s53_s15, 3  ;;  %s76_s22 = sadd.s32 1, %s654_s0 }
   0xd   : > { %s665_s20 = scalar_lea.vmem %s955_s2, %s280_s17  ;;  %s57_s21 = sld [smem:[%s342_s14 + %s343_s16]] }
   0xe   : > { %s72_s23 = sshll.u32 %s665_s20, 4  ;;  %s957_s22 = smov (!%p367_p0, %s76_s22), 0  ;;  %s673_s23 = int_to_ptr.vmem [resolvable:$true] %s72_s23 }
   0xf   : > { %s345_s24 = scalar_select %p367_p0, [#allocation4], [#allocation24] }
  0x10   : > { %s83_s25 = scalar_lea.vmem %s665_s20, 1  ;;  %s97_s27 = sadd.s32 2, %s654_s0 }
  0x11   : > { %s676_s26 = sld [smem:[%s345_s24 + %s957_s22]]  ;;  %s963_s27 = smov (!%p367_p0, %s97_s27), 0 }
  0x12   : > { %s681_s28 = scalar_select %p367_p0, [#allocation4], [#allocation25] }
  0x13   : > { %p58_p2 = scmp.gt.s32.totalorder %s57_s21, 0  ;;  %p282_p3 = scmp.lt.s32.totalorder %s57_s21, 63 }
  0x14   : > { %s690_s4 = sshll.u32 %s83_s25, 4  ;;  %s94_s4 = int_to_ptr.vmem [resolvable:$true] %s690_s4 }
  0x15   : > { %s959_s21 = smov (!%p58_p2, %s57_s21), 0 }
  0x16   : > { %s961_s21 = smov (!%p282_p3, %s959_s21), 63 }
  0x17   : > { %s62_s3 = scalar_lea.hbm %s954_s1, %s961_s21  ;;  %p78_p4 = scmp.gt.s32.totalorder %s676_s26, 0 }
  0x18   : > { %s692_s5 = sshll.u32 %s62_s3, 4  ;;  %p287_p5 = scmp.lt.s32.totalorder %s676_s26, 63  ;;  %s71_s5 = int_to_ptr.hbm [resolvable:$true] %s692_s5 }
  0x19   : > { %s389_s6 = sshra.s32 %s71_s5, 4  ;;  %s390_s6 = int_to_ptr.hbm [resolvable:$true] %s389_s6 }
  0x1a   : > { %s391_s7 = scalar_lea.hbm %s390_s6, 1  ;;  %p396_p9 = scmp.lt.s32.totalorder %s390_s6, %s954_s1 }
  0x1b   : > { %p392_p6 = scmp.ne.s32.totalorder %s390_s6, %s391_s7  ;;  %p397_p10 = scmp.lt.s32.totalorder %s702_s10, %s391_s7 }
  0x1d   : > { %p393_p7 = pnand %p392_p6, %p367_p0  ;;  %p398_p11 = por %p397_p10, %p396_p9 }
  0x1f   : > { %p394_p8 = pneg %p393_p7 }
  0x21   : > { %p399_p12 = pnand %p398_p11, %p394_p8 }
  0x23   : > { %402 = shalt.err (!%p399_p12)  }
  0x24   : > { %s403_s14 = sshra.s32 %s673_s23, 4  ;;  %s714_s18 = scalar_lea.vmem %s955_s2, 16  ;;  %s404_s14 = int_to_ptr.vmem [resolvable:$true] %s403_s14 }
  0x25   : > { %s405_s15 = scalar_lea.vmem %s404_s14, 1  ;;  %p410_p3 = scmp.lt.s32.totalorder %s404_s14, %s955_s2 }
  0x26   : > { %p406_p13 = scmp.ne.s32.totalorder %s404_s14, %s405_s15  ;;  %p411_p6 = scmp.lt.s32.totalorder %s714_s18, %s405_s15 }
  0x28   : > { %p407_p1 = pnand %p406_p13, %p367_p0  ;;  %p412_p7 = por %p411_p6, %p410_p3 }
  0x2a   : > { %p408_p2 = pneg %p407_p1 }
  0x2c   : > { %p413_p8 = pnand %p412_p7, %p408_p2 }
  0x2e   : > { %416 = shalt.err (!%p413_p8)  }
  0x2f   : > { %344 = dma.hbm_to_vmem [thread:$0]  (%p367_p0), %s71_s5, 16, %s673_s23, [#allocation2] }
  0x30   : > { %s79_s22 = scalar_select %p78_p4, %s676_s26, 0 }
  0x31   : > { %s728_s24 = sld [smem:[%s681_s28 + %s963_s27]]  ;;  %s104_s25 = scalar_lea.vmem %s665_s20, 2 }
  0x32   : > { %s965_s22 = smov (!%p287_p5, %s79_s22), 63  ;;  %s737_s7 = sshll.u32 %s104_s25, 4  ;;  %s115_s7 = int_to_ptr.vmem [resolvable:$true] %s737_s7 }
  0x33   : > { %s82_s3 = scalar_lea.hbm %s954_s1, %s965_s22  ;;  %s118_s8 = sadd.s32 3, %s654_s0 }
  0x34   : > { %s91_s6 = sshll.u32 %s82_s3, 4  ;;  %s92_s6 = int_to_ptr.hbm [resolvable:$true] %s91_s6 }
  0x35   : > { %s417_s9 = sshra.s32 %s92_s6, 4  ;;  %s418_s9 = int_to_ptr.hbm [resolvable:$true] %s417_s9 }
  0x36   : > { %s419_s23 = scalar_lea.hbm %s418_s9, 1  ;;  %p424_p5 = scmp.lt.s32.totalorder %s418_s9, %s954_s1 }
  0x37   : > { %p420_p4 = scmp.ne.s32.totalorder %s418_s9, %s419_s23  ;;  %p425_p11 = scmp.lt.s32.totalorder %s702_s10, %s419_s23 }
  0x39   : > { %p421_p9 = pnand %p420_p4, %p367_p0  ;;  %p426_p12 = por %p425_p11, %p424_p5 }
  0x3b   : > { %p422_p10 = pneg %p421_p9 }
  0x3d   : > { %p427_p13 = pnand %p426_p12, %p422_p10 }
  0x3f   : > { %430 = shalt.err (!%p427_p13)  }
  0x40   : > { %s431_s28 = sshra.s32 %s94_s4, 4  ;;  %s432_s28 = int_to_ptr.vmem [resolvable:$true] %s431_s28 }
  0x41   : > { %s433_s5 = scalar_lea.vmem %s432_s28, 1  ;;  %p438_p6 = scmp.lt.s32.totalorder %s432_s28, %s955_s2 }
  0x42   : > { %p434_p1 = scmp.ne.s32.totalorder %s432_s28, %s433_s5  ;;  %p439_p7 = scmp.lt.s32.totalorder %s714_s18, %s433_s5 }
  0x44   : > { %p435_p2 = pnand %p434_p1, %p367_p0  ;;  %p440_p8 = por %p439_p7, %p438_p6 }
  0x46   : > { %p436_p3 = pneg %p435_p2 }
  0x48   : > { %p441_p4 = pnand %p440_p8, %p436_p3 }
  0x4a   : > { %444 = shalt.err (!%p441_p4)  }
  0x4b   : > { %347 = dma.hbm_to_vmem [thread:$0]  (%p367_p0), %s92_s6, 16, %s94_s4, [#allocation2] }
  0x4c   : > { %p99_p9 = scmp.gt.s32.totalorder %s728_s24, 0  ;;  %p292_p10 = scmp.lt.s32.totalorder %s728_s24, 63 }
  0x4d   : > { %s351_s14 = scalar_select %p367_p0, [#allocation4], [#allocation26] }
  0x4e   : > { %s967_s24 = smov (!%p99_p9, %s728_s24), 0  ;;  %s969_s8 = smov (!%p367_p0, %s118_s8), 0 }
  0x4f   : > { %s971_s24 = smov (!%p292_p10, %s967_s24), 63  ;;  %s761_s15 = sld [smem:[%s351_s14 + %s969_s8]] }
  0x50   : > { %s103_s19 = scalar_lea.hbm %s954_s1, %s971_s24  ;;  %s125_s22 = scalar_lea.vmem %s665_s20, 3 }
  0x51   : > { %s112_s21 = sshll.u32 %s103_s19, 4  ;;  %s139_s4 = sadd.s32 4, %s654_s0  ;;  %s113_s21 = int_to_ptr.hbm [resolvable:$true] %s112_s21 }
  0x52   : > { %s445_s25 = sshra.s32 %s113_s21, 4  ;;  %s446_s25 = int_to_ptr.hbm [resolvable:$true] %s445_s25 }
  0x53   : > { %s447_s29 = scalar_lea.hbm %s446_s25, 1  ;;  %p452_p13 = scmp.lt.s32.totalorder %s446_s25, %s954_s1 }
  0x54   : > { %p448_p5 = scmp.ne.s32.totalorder %s446_s25, %s447_s29  ;;  %p453_p1 = scmp.lt.s32.totalorder %s702_s10, %s447_s29 }
  0x56   : > { %p449_p11 = pnand %p448_p5, %p367_p0  ;;  %p454_p2 = por %p453_p1, %p452_p13 }
  0x58   : > { %p450_p12 = pneg %p449_p11 }
  0x5a   : > { %p455_p3 = pnand %p454_p2, %p450_p12 }
  0x5c   : > { %458 = shalt.err (!%p455_p3)  }
  0x5d   : > { %s459_s24 = sshra.s32 %s115_s7, 4  ;;  %s460_s24 = int_to_ptr.vmem [resolvable:$true] %s459_s24 }
  0x5e   : > { %s461_s6 = scalar_lea.vmem %s460_s24, 1  ;;  %p466_p4 = scmp.lt.s32.totalorder %s460_s24, %s955_s2 }
  0x5f   : > { %p462_p6 = scmp.ne.s32.totalorder %s460_s24, %s461_s6  ;;  %p467_p9 = scmp.lt.s32.totalorder %s714_s18, %s461_s6 }
  0x61   : > { %p463_p7 = pnand %p462_p6, %p367_p0  ;;  %p468_p10 = por %p467_p9, %p466_p4 }
  0x63   : > { %p464_p8 = pneg %p463_p7 }
  0x65   : > { %p469_p5 = pnand %p468_p10, %p464_p8 }
  0x67   : > { %472 = shalt.err (!%p469_p5)  }
  0x68   : > { %350 = dma.hbm_to_vmem [thread:$0]  (%p367_p0), %s113_s21, 16, %s115_s7, [#allocation2] }
  0x69   : > { %s354_s23 = scalar_select %p367_p0, [#allocation4], [#allocation27] }
  0x6a   : > { %p120_p11 = scmp.gt.s32.totalorder %s761_s15, 0  ;;  %p297_p12 = scmp.lt.s32.totalorder %s761_s15, 63 }
  0x6b   : > { %s973_s4 = smov (!%p367_p0, %s139_s4), 0  ;;  %s792_s27 = sshll.u32 %s125_s22, 4  ;;  %s136_s27 = int_to_ptr.vmem [resolvable:$true] %s792_s27 }
  0x6c   : > { %s975_s15 = smov (!%p120_p11, %s761_s15), 0  ;;  %s794_s26 = sld [smem:[%s354_s23 + %s973_s4]] }
  0x6d   : > { %s977_s15 = smov (!%p297_p12, %s975_s15), 63  ;;  %s146_s14 = scalar_lea.vmem %s665_s20, 4 }
  0x6e   : > { %s798_s28 = scalar_select %p367_p0, [#allocation4], [#allocation28] }
  0x6f   : > { %s124_s11 = scalar_lea.hbm %s954_s1, %s977_s15  ;;  %s160_s16 = sadd.s32 5, %s654_s0 }
  0x70   : > { %s133_s12 = sshll.u32 %s124_s11, 4  ;;  %s134_s12 = int_to_ptr.hbm [resolvable:$true] %s133_s12 }
  0x71   : > { %s473_s17 = sshra.s32 %s134_s12, 4  ;;  %s474_s17 = int_to_ptr.hbm [resolvable:$true] %s473_s17 }
  0x72   : > { %s475_s19 = scalar_lea.hbm %s474_s17, 1  ;;  %p480_p3 = scmp.lt.s32.totalorder %s474_s17, %s954_s1 }
  0x73   : > { %p476_p13 = scmp.ne.s32.totalorder %s474_s17, %s475_s19  ;;  %p481_p6 = scmp.lt.s32.totalorder %s702_s10, %s475_s19 }
  0x75   : > { %p477_p1 = pnand %p476_p13, %p367_p0  ;;  %p482_p7 = por %p481_p6, %p480_p3 }
  0x77   : > { %p478_p2 = pneg %p477_p1 }
  0x79   : > { %p483_p8 = pnand %p482_p7, %p478_p2 }
  0x7b   : > { %486 = shalt.err (!%p483_p8)  }
  0x7c   : > { %s487_s15 = sshra.s32 %s136_s27, 4  ;;  %s488_s15 = int_to_ptr.vmem [resolvable:$true] %s487_s15 }
  0x7d   : > { %s489_s4 = scalar_lea.vmem %s488_s15, 1  ;;  %p494_p5 = scmp.lt.s32.totalorder %s488_s15, %s955_s2 }
  0x7e   : > { %p490_p4 = scmp.ne.s32.totalorder %s488_s15, %s489_s4  ;;  %p495_p11 = scmp.lt.s32.totalorder %s714_s18, %s489_s4 }
  0x80   : > { %p491_p9 = pnand %p490_p4, %p367_p0  ;;  %p496_p12 = por %p495_p11, %p494_p5 }
  0x82   : > { %p492_p10 = pneg %p491_p9 }
  0x84   : > { %p497_p13 = pnand %p496_p12, %p492_p10 }
  0x86   : > { %500 = shalt.err (!%p497_p13)  }
  0x87   : > { %353 = dma.hbm_to_vmem [thread:$0]  (%p367_p0), %s134_s12, 16, %s136_s27, [#allocation2] }
  0x88   : > { %p141_p1 = scmp.gt.s32.totalorder %s794_s26, 0  ;;  %p302_p2 = scmp.lt.s32.totalorder %s794_s26, 63 }
  0x89   : > { %s979_s16 = smov (!%p367_p0, %s160_s16), 0  ;;  %s827_s30 = sshll.u32 %s146_s14, 4  ;;  %s157_s30 = int_to_ptr.vmem [resolvable:$true] %s827_s30 }
  0x8a   : > { %s981_s26 = smov (!%p141_p1, %s794_s26), 0  ;;  %s830_s3 = sld [smem:[%s798_s28 + %s979_s16]] }
  0x8b   : > { %s983_s26 = smov (!%p302_p2, %s981_s26), 63  ;;  %s167_s27 = scalar_lea.vmem %s665_s20, 5 }
  0x8c   : > { %s834_s24 = scalar_select %p367_p0, [#allocation4], [#allocation29] }
  0x8d   : > { %s145_s9 = scalar_lea.hbm %s954_s1, %s983_s26  ;;  %s181_s7 = sadd.s32 6, %s654_s0 }
  0x8e   : > { %s154_s23 = sshll.u32 %s145_s9, 4  ;;  %s155_s23 = int_to_ptr.hbm [resolvable:$true] %s154_s23 }
  0x8f   : > { %s501_s5 = sshra.s32 %s155_s23, 4  ;;  %s502_s5 = int_to_ptr.hbm [resolvable:$true] %s501_s5 }
  0x90   : > { %s503_s11 = scalar_lea.hbm %s502_s5, 1  ;;  %p508_p8 = scmp.lt.s32.totalorder %s502_s5, %s954_s1 }
  0x91   : > { %p504_p3 = scmp.ne.s32.totalorder %s502_s5, %s503_s11  ;;  %p509_p4 = scmp.lt.s32.totalorder %s702_s10, %s503_s11 }
  0x93   : > { %p505_p6 = pnand %p504_p3, %p367_p0  ;;  %p510_p9 = por %p509_p4, %p508_p8 }
  0x95   : > { %p506_p7 = pneg %p505_p6 }
  0x97   : > { %p511_p10 = pnand %p510_p9, %p506_p7 }
  0x99   : > { %514 = shalt.err (!%p511_p10)  }
  0x9a   : > { %s515_s26 = sshra.s32 %s157_s30, 4  ;;  %s516_s26 = int_to_ptr.vmem [resolvable:$true] %s515_s26 }
  0x9b   : > { %s517_s14 = scalar_lea.vmem %s516_s26, 1  ;;  %p522_p13 = scmp.lt.s32.totalorder %s516_s26, %s955_s2 }
  0x9c   : > { %p518_p5 = scmp.ne.s32.totalorder %s516_s26, %s517_s14  ;;  %p523_p1 = scmp.lt.s32.totalorder %s714_s18, %s517_s14 }
  0x9e   : > { %p519_p11 = pnand %p518_p5, %p367_p0  ;;  %p524_p2 = por %p523_p1, %p522_p13 }
  0xa0   : > { %p520_p12 = pneg %p519_p11 }
  0xa2   : > { %p525_p3 = pnand %p524_p2, %p520_p12 }
  0xa4   : > { %528 = shalt.err (!%p525_p3)  }
  0xa5   : > { %356 = dma.hbm_to_vmem [thread:$0]  (%p367_p0), %s155_s23, 16, %s157_s30, [#allocation2] }
  0xa6   : > { %p162_p6 = scmp.gt.s32.totalorder %s830_s3, 0  ;;  %p307_p7 = scmp.lt.s32.totalorder %s830_s3, 63 }
  0xa7   : > { %s985_s7 = smov (!%p367_p0, %s181_s7), 0  ;;  %s863_s19 = sshll.u32 %s167_s27, 4  ;;  %s178_s19 = int_to_ptr.vmem [resolvable:$true] %s863_s19 }
  0xa8   : > { %s987_s3 = smov (!%p162_p6, %s830_s3), 0  ;;  %s866_s21 = sld [smem:[%s834_s24 + %s985_s7]] }
  0xa9   : > { %s989_s3 = smov (!%p307_p7, %s987_s3), 63  ;;  %s188_s30 = scalar_lea.vmem %s665_s20, 6 }
  0xaa   : > { %s870_s22 = scalar_select %p367_p0, [#allocation4], [#allocation30] }
  0xab   : > { %s166_s25 = scalar_lea.hbm %s954_s1, %s989_s3  ;;  %s202_s6 = sadd.s32 7, %s654_s0 }
  0xac   : > { %s175_s29 = sshll.u32 %s166_s25, 4  ;;  %s176_s29 = int_to_ptr.hbm [resolvable:$true] %s175_s29 }
  0xad   : > { %s529_s8 = sshra.s32 %s176_s29, 4  ;;  %s530_s8 = int_to_ptr.hbm [resolvable:$true] %s529_s8 }
  0xae   : > { %s531_s9 = scalar_lea.hbm %s530_s8, 1  ;;  %p536_p10 = scmp.lt.s32.totalorder %s530_s8, %s954_s1 }
  0xaf   : > { %p532_p8 = scmp.ne.s32.totalorder %s530_s8, %s531_s9  ;;  %p537_p5 = scmp.lt.s32.totalorder %s702_s10, %s531_s9 }
  0xb1   : > { %p533_p4 = pnand %p532_p8, %p367_p0  ;;  %p538_p11 = por %p537_p5, %p536_p10 }
  0xb3   : > { %p534_p9 = pneg %p533_p4 }
  0xb5   : > { %p539_p12 = pnand %p538_p11, %p534_p9 }
  0xb7   : > { %542 = shalt.err (!%p539_p12)  }
  0xb8   : > { %s543_s3 = sshra.s32 %s178_s19, 4  ;;  %s544_s3 = int_to_ptr.vmem [resolvable:$true] %s543_s3 }
  0xb9   : > { %s545_s0 = scalar_lea.vmem %s544_s3, 1  ;;  %p550_p3 = scmp.lt.s32.totalorder %s544_s3, %s955_s2 }
  0xba   : > { %p546_p13 = scmp.ne.s32.totalorder %s544_s3, %s545_s0  ;;  %p551_p6 = scmp.lt.s32.totalorder %s714_s18, %s545_s0 }
  0xbc   : > { %p547_p1 = pnand %p546_p13, %p367_p0  ;;  %p552_p7 = por %p551_p6, %p550_p3 }
  0xbe   : > { %p548_p2 = pneg %p547_p1 }
  0xc0   : > { %p553_p8 = pnand %p552_p7, %p548_p2 }
  0xc2   : > { %556 = shalt.err (!%p553_p8)  }
  0xc3   : > { %359 = dma.hbm_to_vmem [thread:$0]  (%p367_p0), %s176_s29, 16, %s178_s19, [#allocation2] }
  0xc4   : > { %p183_p4 = scmp.gt.s32.totalorder %s866_s21, 0  ;;  %p312_p9 = scmp.lt.s32.totalorder %s866_s21, 63 }
  0xc5   : > { %s991_s6 = smov (!%p367_p0, %s202_s6), 0  ;;  %s899_s5 = sshll.u32 %s188_s30, 4  ;;  %s199_s5 = int_to_ptr.vmem [resolvable:$true] %s899_s5 }
  0xc6   : > { %s993_s21 = smov (!%p183_p4, %s866_s21), 0  ;;  %s902_s11 = sld [smem:[%s870_s22 + %s991_s6]] }
  0xc7   : > { %s995_s21 = smov (!%p312_p9, %s993_s21), 63  ;;  %s209_s16 = scalar_lea.vmem %s665_s20, 7 }
  0xc8   : > { %s187_s26 = scalar_lea.hbm %s954_s1, %s995_s21 }
  0xc9   : > { %s196_s14 = sshll.u32 %s187_s26, 4  ;;  %s197_s14 = int_to_ptr.hbm [resolvable:$true] %s196_s14 }
  0xca   : > { %s557_s17 = sshra.s32 %s197_s14, 4  ;;  %s558_s17 = int_to_ptr.hbm [resolvable:$true] %s557_s17 }
  0xcb   : > { %s559_s19 = scalar_lea.hbm %s558_s17, 1  ;;  %p564_p12 = scmp.lt.s32.totalorder %s558_s17, %s954_s1 }
  0xcc   : > { %p560_p10 = scmp.ne.s32.totalorder %s558_s17, %s559_s19  ;;  %p565_p13 = scmp.lt.s32.totalorder %s702_s10, %s559_s19 }
  0xce   : > { %p561_p5 = pnand %p560_p10, %p367_p0  ;;  %p566_p1 = por %p565_p13, %p564_p12 }
  0xd0   : > { %p562_p11 = pneg %p561_p5 }
  0xd2   : > { %p567_p2 = pnand %p566_p1, %p562_p11 }
  0xd4   : > { %570 = shalt.err (!%p567_p2)  }
  0xd5   : > { %s571_s21 = sshra.s32 %s199_s5, 4  ;;  %s572_s21 = int_to_ptr.vmem [resolvable:$true] %s571_s21 }
  0xd6   : > { %s573_s20 = scalar_lea.vmem %s572_s21, 1  ;;  %p578_p8 = scmp.lt.s32.totalorder %s572_s21, %s955_s2 }
  0xd7   : > { %p574_p3 = scmp.ne.s32.totalorder %s572_s21, %s573_s20  ;;  %p579_p4 = scmp.lt.s32.totalorder %s714_s18, %s573_s20 }
  0xd9   : > { %p575_p6 = pnand %p574_p3, %p367_p0  ;;  %p580_p9 = por %p579_p4, %p578_p8 }
  0xdb   : > { %p576_p7 = pneg %p575_p6 }
  0xdd   : > { %p581_p10 = pnand %p580_p9, %p576_p7 }
  0xdf   : > { %584 = shalt.err (!%p581_p10)  }
  0xe0   : > { %362 = dma.hbm_to_vmem [thread:$0]  (%p367_p0), %s197_s14, 16, %s199_s5, [#allocation2] }
  0xe1   : > { %p204_p5 = scmp.gt.s32.totalorder %s902_s11, 0  ;;  %p317_p11 = scmp.lt.s32.totalorder %s902_s11, 63 }
  0xe2   : > { %s926_s29 = sshll.u32 %s209_s16, 4  ;;  %s220_s29 = int_to_ptr.vmem [resolvable:$true] %s926_s29 }
  0xe3   : > { %s997_s11 = smov (!%p204_p5, %s902_s11), 0 }
  0xe4   : > { %s999_s11 = smov (!%p317_p11, %s997_s11), 63 }
  0xe5   : > { %s208_s8 = scalar_lea.hbm %s954_s1, %s999_s11 }
  0xe6   : > { %s217_s9 = sshll.u32 %s208_s8, 4  ;;  %s218_s9 = int_to_ptr.hbm [resolvable:$true] %s217_s9 }
  0xe7   : > { %s585_s24 = sshra.s32 %s218_s9, 4  ;;  %s586_s24 = int_to_ptr.hbm [resolvable:$true] %s585_s24 }
  0xe8   : > { %s587_s23 = scalar_lea.hbm %s586_s24, 1  ;;  %p592_p2 = scmp.lt.s32.totalorder %s586_s24, %s954_s1 }
  0xe9   : > { %p588_p12 = scmp.ne.s32.totalorder %s586_s24, %s587_s23  ;;  %p593_p3 = scmp.lt.s32.totalorder %s702_s10, %s587_s23 }
  0xeb   : > { %p589_p13 = pnand %p588_p12, %p367_p0  ;;  %p594_p6 = por %p593_p3, %p592_p2 }
  0xed   : > { %p590_p1 = pneg %p589_p13 }
  0xef   : > { %p595_p7 = pnand %p594_p6, %p590_p1 }
  0xf1   : > { %598 = shalt.err (!%p595_p7)  }
  0xf2   : > { %s599_s27 = sshra.s32 %s220_s29, 4  ;;  %s600_s27 = int_to_ptr.vmem [resolvable:$true] %s599_s27 }
  0xf3   : > { %s601_s7 = scalar_lea.vmem %s600_s27, 1  ;;  %p606_p10 = scmp.lt.s32.totalorder %s600_s27, %s955_s2 }
  0xf4   : > { %p602_p8 = scmp.ne.s32.totalorder %s600_s27, %s601_s7  ;;  %p607_p5 = scmp.lt.s32.totalorder %s714_s18, %s601_s7 }
  0xf6   : > { %p603_p4 = pnand %p602_p8, %p367_p0  ;;  %p608_p11 = por %p607_p5, %p606_p10 }
  0xf8   : > { %p604_p9 = pneg %p603_p4 }
  0xfa   : > { %p609_p12 = pnand %p608_p11, %p604_p9 }
  0xfc   : > { %612 = shalt.err (!%p609_p12)  }
  0xfd   : > { %365 = dma.hbm_to_vmem [thread:$0]  (%p367_p0), %s218_s9, 16, %s220_s29, [#allocation2] }
  0xfe   : > { %620 = dma.done.wait (%p367_p0), [#allocation2], 128 }
  0xff   : > { %622 = vsyncadd (%p367_p0), [#allocation2], 4294967168  ;;  %s20_s13 = sadd.s32 1, %s625_s13  }
 0x100   : > { %p17_p13 = scmp.ge.s32.totalorder %s20_s13, 3  }
 0x102   :  { %19 = sbr.rel (!%p17_p13) target bundleno = 7 (0x7), region = 86 }
 0x107   :  { %245 = vsyncmov [#allocation2] }
 0x10a   :  { %s246_s10 = vpop.sfrf %245 }
 0x10b   :  { %p324_p1 = scmp.ne.s32.totalorder %s246_s10, 0 }
 0x10d   :  { %250 = shalt.err (%p324_p1)  }

</bundles_post_ra>
